<compile_context>
chip_gen: v7x
topology: tpu7x:2x2x1
jax: 0.10.0
libtpu: 0.0.40
codegen_flags: <defaults>
</compile_context>

<pallas_src>
import functools
import numpy as np
import jax
import jax.numpy as jnp
from jax import lax
from jax.experimental import pallas as pl
from jax.experimental.pallas import tpu as pltpu

WIN = 15          # module default: win=[15] -> (15, 15) for 2-D inputs


def _ncc_kernel(i_ref, j_ref, bh_ref, bw_ref, out_ref, *, win_size, pad):
    B, H, W = i_ref.shape
    # Stack the B images of this block along the sublane (row) axis.
    I2 = i_ref[...].astype(jnp.float32).reshape(B * H, W)
    J2 = j_ref[...].astype(jnp.float32).reshape(B * H, W)

    # --- Weighted global sums (replace the I*I, J*J, I*J box-filter planes) ---
    # coverage(h, w) = (#valid window centers covering row h) *
    #                  (#valid window centers covering col w)
    hi = lax.broadcasted_iota(jnp.int32, (B, H, W), 1).reshape(B * H, W)
    wi = lax.broadcasted_iota(jnp.int32, (B * H, W), 1)
    ch = jnp.minimum(hi, pad) + jnp.minimum((H - 1) - hi, pad) + 1
    cw = jnp.minimum(wi, pad) + jnp.minimum((W - 1) - wi, pad) + 1
    cov = (ch * cw).astype(jnp.float32)                       # [B*H, W]

    covI = cov * I2
    g_ij = jnp.sum(covI * J2)          # == sum(conv(I*J))
    g_ii = jnp.sum(covI * I2)          # == sum(conv(I*I))
    g_jj = jnp.sum(cov * (J2 * J2))    # == sum(conv(J*J))

    # --- Per-pixel box sums for I and J only (two small band matmuls each) ---
    # 15x15 'same' conv with zero padding folded into the clipped {0,1} bands.
    bh = bh_ref[...]                   # [B*H, B*H] block-diag row band
    bw = bw_ref[...]                   # [W, W]     column band
    I_s = jnp.dot(jnp.dot(bh, I2, preferred_element_type=jnp.float32), bw,
                  preferred_element_type=jnp.float32)          # [B*H, W]
    J_s = jnp.dot(jnp.dot(bh, J2, preferred_element_type=jnp.float32), bw,
                  preferred_element_type=jnp.float32)          # [B*H, W]

    s_ij = jnp.sum(I_s * J_s)
    s_ii = jnp.sum(I_s * I_s)
    s_jj = jnp.sum(J_s * J_s)

    # sum(cross) = sum(IJ_sum) - (1/ws) * <I_s, J_s>     (and likewise for vars)
    inv_ws = 1.0 / win_size
    cross_p = g_ij - inv_ws * s_ij
    ivar_p = g_ii - inv_ws * s_ii
    jvar_p = g_jj - inv_ws * s_jj

    # Single lane-aligned output slab per grid step: lanes 0..2 of row 0 hold
    # (cross, i_var, j_var) partial sums; the rest is zero filler.
    lane = lax.broadcasted_iota(jnp.int32, out_ref.shape, 2)
    out_ref[...] = jnp.where(lane == 0, cross_p,
                   jnp.where(lane == 1, ivar_p,
                   jnp.where(lane == 2, jvar_p, 0.0)))


def ncc_loss_pallas(I, J, win=(WIN,)):
    """I, J: [N, 1, H, W] float32 (NCHW). Returns scalar -NCC, as in PyTorch."""
    N, C, H, W = I.shape
    assert C == 1, "PyTorch module's conv weight [1,1,w,w] requires C == 1"
    w = int(win[0])
    assert w % 2 == 1, "clipped-band formulation assumes an odd window"
    pad = w // 2

    # Images per grid step: cap B*H at ~128 sublanes so the block-diagonal row
    # band wastes at most that much MXU work, and keep G >= 2 when N >= 2 so
    # both v7x TensorCores get a grid step.
    B = 1 if H >= 128 else max(1, 128 // H)
    B = min(B, N)
    if N >= 2:
        B = min(B, (N + 1) // 2)
    G = pl.cdiv(N, B)
    Npad = G * B

    Ii = I[:, 0].astype(jnp.float32)
    Jj = J[:, 0].astype(jnp.float32)
    if Npad != N:
        # Zero images contribute exactly 0 to all three partial sums
        # (the normalization happens in the wrapper, so this stays exact).
        Ii = jnp.pad(Ii, ((0, Npad - N), (0, 0), (0, 0)))
        Jj = jnp.pad(Jj, ((0, Npad - N), (0, 0), (0, 0)))

    # Clipped banded {0,1} matrices: band[r, r'] = 1 iff |r - r'| <= pad.
    hh = np.arange(H)
    band_h = (np.abs(hh[:, None] - hh[None, :]) <= pad).astype(np.float32)  # [H, H]
    ww = np.arange(W)
    band_w = (np.abs(ww[:, None] - ww[None, :]) <= pad).astype(np.float32)  # [W, W]
    bh_block = jnp.asarray(np.kron(np.eye(B, dtype=np.float32), band_h))    # [B*H, B*H]
    bw = jnp.asarray(band_w)                                                # [W, W]

    kernel = functools.partial(_ncc_kernel, win_size=float(w * w), pad=pad)

    # Explicit VMEM budget: 2x double-buffered image blocks, single-buffered
    # bands, ~4 [B*H, W] f32 intermediates, plus the output slab.  Headroom 2x,
    # capped safely below v7x's 64 MiB physical VMEM.
    vmem_est = (2 * 2 * B * H * W * 4
                + (B * H) * (B * H) * 4 + W * W * 4
                + 8 * B * H * W * 4
                + 2 * 8 * 128 * 4)
    vmem_limit = int(min(max(2 * vmem_est, 16 * 1024 * 1024), 48 * 1024 * 1024))

    parts = pl.pallas_call(
        kernel,
        out_shape=jax.ShapeDtypeStruct((G, 8, 128), jnp.float32),
        grid_spec=pltpu.PrefetchScalarGridSpec(
            num_scalar_prefetch=0,
            grid=(G,),
            in_specs=[
                pl.BlockSpec((B, H, W), lambda g: (g, 0, 0)),
                pl.BlockSpec((B, H, W), lambda g: (g, 0, 0)),
                # Grid-invariant band operands: single-buffered.
                pl.BlockSpec((B * H, B * H), lambda g: (0, 0),
                             pipeline_mode=pl.Buffered(1)),
                pl.BlockSpec((W, W), lambda g: (0, 0),
                             pipeline_mode=pl.Buffered(1)),
            ],
            out_specs=pl.BlockSpec((1, 8, 128), lambda g: (g, 0, 0)),
        ),
        compiler_params=pltpu.CompilerParams(
            dimension_semantics=("parallel",),
            vmem_limit_bytes=vmem_limit),
    )(Ii, Jj, bh_block, bw)

    cross = jnp.sum(parts[:, 0, 0])
    i_var = jnp.sum(parts[:, 0, 1])
    j_var = jnp.sum(parts[:, 0, 2])
    cc = cross / jnp.sqrt(i_var * j_var)   # no eps, matching the PyTorch module
    return -cc


def ncc_loss_ref(I, J, win=WIN):
    """Pure-JAX reference mirroring the PyTorch forward (for verification)."""
    pad = win // 2
    filt = jnp.ones((1, 1, win, win), jnp.float32)

    def conv(x):
        return jax.lax.conv_general_dilated(
            x, filt, window_strides=(1, 1),
            padding=[(pad, pad), (pad, pad)],
            dimension_numbers=("NCHW", "OIHW", "NCHW"))

    I_sum, J_sum = conv(I), conv(J)
    I2_sum, J2_sum, IJ_sum = conv(I * I), conv(J * J), conv(I * J)
    win_size = float(win * win)
    u_I, u_J = I_sum / win_size, J_sum / win_size
    cross = IJ_sum - u_J * I_sum - u_I * J_sum + u_I * u_J * win_size
    I_var = I2_sum - 2.0 * u_I * I_sum + u_I * u_I * win_size
    J_var = J2_sum - 2.0 * u_J * J_sum + u_J * u_J * win_size
    cc = jnp.sum(cross) / jnp.sqrt(jnp.sum(I_var) * jnp.sum(J_var))
    return -cc


if __name__ == "__main__":
    key = jax.random.PRNGKey(0)
    k1, k2 = jax.random.split(key)
    N, C, H, W = 8, 1, 16, 16
    I = jax.random.normal(k1, (N, C, H, W), dtype=jnp.float32)
    J = jax.random.normal(k2, (N, C, H, W), dtype=jnp.float32)

    loss = ncc_loss_pallas(I, J)
    jax.block_until_ready(loss)

    ref = ncc_loss_ref(I, J)
    np.testing.assert_allclose(np.asarray(loss), np.asarray(ref),
                               rtol=1e-3, atol=1e-3)
    print("KERNEL_OK")
</pallas_src>

<mosaic_0001>
module attributes {stable_mosaic.version = 11 : i64} {
  func.func @_ncc_kernel(%arg0: i32, %arg1: memref<4x16x16xf32, #tpu.memory_space<vmem>>, %arg2: memref<4x16x16xf32, #tpu.memory_space<vmem>>, %arg3: memref<64x64xf32, #tpu.memory_space<vmem>>, %arg4: memref<16x16xf32, #tpu.memory_space<vmem>>, %arg5: memref<1x8x128xf32, #tpu.memory_space<vmem>>) attributes {dimension_semantics = [#tpu.dimension_semantics<parallel>], iteration_bounds = array<i64: 2>, scalar_prefetch = 0 : i64, scratch_operands = 0 : i64, tpu.core_type = #tpu.core_type<tc>, window_params = [{transform_indices = @transform_0, window_bounds = array<i64: 4, 16, 16>}, {transform_indices = @transform_1, window_bounds = array<i64: 4, 16, 16>}, {pipeline_mode = #tpu.pipeline_mode<synchronous>, transform_indices = @transform_2, window_bounds = array<i64: 64, 64>}, {pipeline_mode = #tpu.pipeline_mode<synchronous>, transform_indices = @transform_3, window_bounds = array<i64: 16, 16>}, {transform_indices = @transform_4, window_bounds = array<i64: 1, 8, 128>}]} {
    %c0 = arith.constant 0 : index
    %c0_0 = arith.constant 0 : index
    %c0_1 = arith.constant 0 : index
    %0 = vector.load %arg1[%c0, %c0_0, %c0_1] : memref<4x16x16xf32, #tpu.memory_space<vmem>>, vector<4x16x16xf32>
    %1 = vector.shape_cast %0 : vector<4x16x16xf32> to vector<64x16xf32>
    %c0_2 = arith.constant 0 : index
    %c0_3 = arith.constant 0 : index
    %c0_4 = arith.constant 0 : index
    %2 = vector.load %arg2[%c0_2, %c0_3, %c0_4] : memref<4x16x16xf32, #tpu.memory_space<vmem>>, vector<4x16x16xf32>
    %3 = vector.shape_cast %2 : vector<4x16x16xf32> to vector<64x16xf32>
    %4 = tpu.iota {dimensions = array<i32: 1>} : vector<4x16x16xi32>
    %5 = vector.shape_cast %4 : vector<4x16x16xi32> to vector<64x16xi32>
    %6 = tpu.iota {dimensions = array<i32: 1>} : vector<64x16xi32>
    %c7_i32 = arith.constant 7 : i32
    %7 = vector.broadcast %c7_i32 : i32 to vector<64x16xi32>
    %8 = arith.minsi %5, %7 : vector<64x16xi32>
    %c15_i32 = arith.constant 15 : i32
    %9 = vector.broadcast %c15_i32 : i32 to vector<64x16xi32>
    %10 = arith.subi %9, %5 : vector<64x16xi32>
    %c7_i32_5 = arith.constant 7 : i32
    %11 = vector.broadcast %c7_i32_5 : i32 to vector<64x16xi32>
    %12 = arith.minsi %10, %11 : vector<64x16xi32>
    %13 = arith.addi %8, %12 : vector<64x16xi32>
    %c1_i32 = arith.constant 1 : i32
    %14 = vector.broadcast %c1_i32 : i32 to vector<64x16xi32>
    %15 = arith.addi %13, %14 : vector<64x16xi32>
    %c7_i32_6 = arith.constant 7 : i32
    %16 = vector.broadcast %c7_i32_6 : i32 to vector<64x16xi32>
    %17 = arith.minsi %6, %16 : vector<64x16xi32>
    %c15_i32_7 = arith.constant 15 : i32
    %18 = vector.broadcast %c15_i32_7 : i32 to vector<64x16xi32>
    %19 = arith.subi %18, %6 : vector<64x16xi32>
    %c7_i32_8 = arith.constant 7 : i32
    %20 = vector.broadcast %c7_i32_8 : i32 to vector<64x16xi32>
    %21 = arith.minsi %19, %20 : vector<64x16xi32>
    %22 = arith.addi %17, %21 : vector<64x16xi32>
    %c1_i32_9 = arith.constant 1 : i32
    %23 = vector.broadcast %c1_i32_9 : i32 to vector<64x16xi32>
    %24 = arith.addi %22, %23 : vector<64x16xi32>
    %25 = arith.muli %15, %24 : vector<64x16xi32>
    %26 = arith.sitofp %25 : vector<64x16xi32> to vector<64x16xf32>
    %27 = arith.mulf %26, %1 : vector<64x16xf32>
    %28 = arith.mulf %27, %3 : vector<64x16xf32>
    %29 = vector.shape_cast %28 : vector<64x16xf32> to vector<1x64x16xf32>
    %cst = arith.constant dense<0.000000e+00> : vector<1xf32>
    %30 = vector.multi_reduction <add>, %29, %cst [1, 2] : vector<1x64x16xf32> to vector<1xf32>
    %31 = vector.shape_cast %30 : vector<1xf32> to vector<1x1x1xf32>
    %32 = vector.extract %31[0, 0, 0] : f32 from vector<1x1x1xf32>
    %33 = arith.mulf %27, %1 : vector<64x16xf32>
    %34 = vector.shape_cast %33 : vector<64x16xf32> to vector<1x64x16xf32>
    %cst_10 = arith.constant dense<0.000000e+00> : vector<1xf32>
    %35 = vector.multi_reduction <add>, %34, %cst_10 [1, 2] : vector<1x64x16xf32> to vector<1xf32>
    %36 = vector.shape_cast %35 : vector<1xf32> to vector<1x1x1xf32>
    %37 = vector.extract %36[0, 0, 0] : f32 from vector<1x1x1xf32>
    %38 = arith.mulf %3, %3 : vector<64x16xf32>
    %39 = arith.mulf %26, %38 : vector<64x16xf32>
    %40 = vector.shape_cast %39 : vector<64x16xf32> to vector<1x64x16xf32>
    %cst_11 = arith.constant dense<0.000000e+00> : vector<1xf32>
    %41 = vector.multi_reduction <add>, %40, %cst_11 [1, 2] : vector<1x64x16xf32> to vector<1xf32>
    %42 = vector.shape_cast %41 : vector<1xf32> to vector<1x1x1xf32>
    %43 = vector.extract %42[0, 0, 0] : f32 from vector<1x1x1xf32>
    %c0_12 = arith.constant 0 : index
    %c0_13 = arith.constant 0 : index
    %44 = vector.load %arg3[%c0_12, %c0_13] : memref<64x64xf32, #tpu.memory_space<vmem>>, vector<64x64xf32>
    %c0_14 = arith.constant 0 : index
    %c0_15 = arith.constant 0 : index
    %45 = vector.load %arg4[%c0_14, %c0_15] : memref<16x16xf32, #tpu.memory_space<vmem>>, vector<16x16xf32>
    %cst_16 = arith.constant dense<0.000000e+00> : vector<64x16xf32>
    %46 = tpu.matmul %44, %1, %cst_16 {dimension_numbers = #tpu.dot_dimension_numbers<[1], [0], [0], [1], [0, 0, 1, 1], [], []>} : vector<64x64xf32>, vector<64x16xf32>, vector<64x16xf32> -> vector<64x16xf32>
    %cst_17 = arith.constant dense<0.000000e+00> : vector<64x16xf32>
    %47 = tpu.matmul %46, %45, %cst_17 {dimension_numbers = #tpu.dot_dimension_numbers<[1], [0], [0], [1], [0, 0, 1, 1], [], []>} : vector<64x16xf32>, vector<16x16xf32>, vector<64x16xf32> -> vector<64x16xf32>
    %cst_18 = arith.constant dense<0.000000e+00> : vector<64x16xf32>
    %48 = tpu.matmul %44, %3, %cst_18 {dimension_numbers = #tpu.dot_dimension_numbers<[1], [0], [0], [1], [0, 0, 1, 1], [], []>} : vector<64x64xf32>, vector<64x16xf32>, vector<64x16xf32> -> vector<64x16xf32>
    %cst_19 = arith.constant dense<0.000000e+00> : vector<64x16xf32>
    %49 = tpu.matmul %48, %45, %cst_19 {dimension_numbers = #tpu.dot_dimension_numbers<[1], [0], [0], [1], [0, 0, 1, 1], [], []>} : vector<64x16xf32>, vector<16x16xf32>, vector<64x16xf32> -> vector<64x16xf32>
    %50 = arith.mulf %47, %49 : vector<64x16xf32>
    %51 = vector.shape_cast %50 : vector<64x16xf32> to vector<1x64x16xf32>
    %cst_20 = arith.constant dense<0.000000e+00> : vector<1xf32>
    %52 = vector.multi_reduction <add>, %51, %cst_20 [1, 2] : vector<1x64x16xf32> to vector<1xf32>
    %53 = vector.shape_cast %52 : vector<1xf32> to vector<1x1x1xf32>
    %54 = vector.extract %53[0, 0, 0] : f32 from vector<1x1x1xf32>
    %55 = arith.mulf %47, %47 : vector<64x16xf32>
    %56 = vector.shape_cast %55 : vector<64x16xf32> to vector<1x64x16xf32>
    %cst_21 = arith.constant dense<0.000000e+00> : vector<1xf32>
    %57 = vector.multi_reduction <add>, %56, %cst_21 [1, 2] : vector<1x64x16xf32> to vector<1xf32>
    %58 = vector.shape_cast %57 : vector<1xf32> to vector<1x1x1xf32>
    %59 = vector.extract %58[0, 0, 0] : f32 from vector<1x1x1xf32>
    %60 = arith.mulf %49, %49 : vector<64x16xf32>
    %61 = vector.shape_cast %60 : vector<64x16xf32> to vector<1x64x16xf32>
    %cst_22 = arith.constant dense<0.000000e+00> : vector<1xf32>
    %62 = vector.multi_reduction <add>, %61, %cst_22 [1, 2] : vector<1x64x16xf32> to vector<1xf32>
    %63 = vector.shape_cast %62 : vector<1xf32> to vector<1x1x1xf32>
    %64 = vector.extract %63[0, 0, 0] : f32 from vector<1x1x1xf32>
    %cst_23 = arith.constant 0.00444444455 : f32
    %65 = arith.mulf %cst_23, %54 : f32
    %66 = arith.subf %32, %65 : f32
    %cst_24 = arith.constant 0.00444444455 : f32
    %67 = arith.mulf %cst_24, %59 : f32
    %68 = arith.subf %37, %67 : f32
    %cst_25 = arith.constant 0.00444444455 : f32
    %69 = arith.mulf %cst_25, %64 : f32
    %70 = arith.subf %43, %69 : f32
    %71 = tpu.iota {dimensions = array<i32: 2>} : vector<1x8x128xi32>
    %c0_i32 = arith.constant 0 : i32
    %72 = vector.broadcast %c0_i32 : i32 to vector<1x8x128xi32>
    %73 = arith.cmpi eq, %71, %72 : vector<1x8x128xi32>
    %c1_i32_26 = arith.constant 1 : i32
    %74 = vector.broadcast %c1_i32_26 : i32 to vector<1x8x128xi32>
    %75 = arith.cmpi eq, %71, %74 : vector<1x8x128xi32>
    %c2_i32 = arith.constant 2 : i32
    %76 = vector.broadcast %c2_i32 : i32 to vector<1x8x128xi32>
    %77 = arith.cmpi eq, %71, %76 : vector<1x8x128xi32>
    %cst_27 = arith.constant 0.000000e+00 : f32
    %78 = vector.broadcast %70 : f32 to vector<1x8x128xf32>
    %79 = vector.broadcast %cst_27 : f32 to vector<1x8x128xf32>
    %80 = arith.select %77, %78, %79 : vector<1x8x128xi1>, vector<1x8x128xf32>
    %81 = vector.broadcast %68 : f32 to vector<1x8x128xf32>
    %82 = arith.select %75, %81, %80 : vector<1x8x128xi1>, vector<1x8x128xf32>
    %83 = vector.broadcast %66 : f32 to vector<1x8x128xf32>
    %84 = arith.select %73, %83, %82 : vector<1x8x128xi1>, vector<1x8x128xf32>
    %c0_28 = arith.constant 0 : index
    %c0_29 = arith.constant 0 : index
    %c0_30 = arith.constant 0 : index
    %85 = vector.load %arg5[%c0_28, %c0_29, %c0_30] : memref<1x8x128xf32, #tpu.memory_space<vmem>>, vector<1x8x128xf32>
    tpu.vector_store %arg5[%c0_28, %c0_29, %c0_30], %84 {strides = array<i32>} : memref<1x8x128xf32, #tpu.memory_space<vmem>>, vector<1x8x128xf32>,
    return
  }
  func.func @transform_0(%arg0: i32) -> (i32, i32, i32) {
    %c0_i32 = arith.constant 0 : i32
    %c0_i32_0 = arith.constant 0 : i32
    %c0_i32_1 = arith.constant 0 : i32
    return %arg0, %c0_i32, %c0_i32_0 : i32, i32, i32
  }
  func.func @transform_1(%arg0: i32) -> (i32, i32, i32) {
    %c0_i32 = arith.constant 0 : i32
    %c0_i32_0 = arith.constant 0 : i32
    %c0_i32_1 = arith.constant 0 : i32
    return %arg0, %c0_i32, %c0_i32_0 : i32, i32, i32
  }
  func.func @transform_2(%arg0: i32) -> (i32, i32) {
    %c0_i32 = arith.constant 0 : i32
    %c0_i32_0 = arith.constant 0 : i32
    %c0_i32_1 = arith.constant 0 : i32
    return %c0_i32, %c0_i32_0 : i32, i32
  }
  func.func @transform_3(%arg0: i32) -> (i32, i32) {
    %c0_i32 = arith.constant 0 : i32
    %c0_i32_0 = arith.constant 0 : i32
    %c0_i32_1 = arith.constant 0 : i32
    return %c0_i32, %c0_i32_0 : i32, i32
  }
  func.func @transform_4(%arg0: i32) -> (i32, i32, i32) {
    %c0_i32 = arith.constant 0 : i32
    %c0_i32_0 = arith.constant 0 : i32
    %c0_i32_1 = arith.constant 0 : i32
    return %arg0, %c0_i32, %c0_i32_0 : i32, i32, i32
  }
}

</mosaic_0001>

<bundles_post_ra>
// kernel: tpu_custom_call.1
= control target key start
LH: loop header
LB: loop body
LE: loop exit
PB: predicated region body
PF: predicated region fallthrough
CT: control target
= control target key end

     0   :  { %s2308_s0 = inlined_call_operand.hbm [shape: f32[8,16,16], index: 0, kind: input, shape index: {}]   ;;  %s2309_s1 = inlined_call_operand.hbm [shape: f32[8,16,16], index: 1, kind: input, shape index: {}]   ;;  %s2310_s2 = inlined_call_operand.hbm [shape: f32[64,64], index: 2, kind: input, shape index: {}]   ;;  %s2311_s3 = inlined_call_operand.hbm [shape: f32[16,16], index: 3, kind: input, shape index: {}]   ;;  %s2312_s4 = inlined_call_operand.hbm [shape: f32[2,8,128], index: 4, kind: output, shape index: {}]  }
   0x1   :  { %2320 = sst [smem:[#allocation16_spill]] %s2308_s0 }
   0x2   :  { %9 = vsyncpa [#allocation3], 0 }
   0x3   :  { %11 = vsyncpa [#allocation3 + $0x1], 0 }
   0x4   :  { %12 = vsyncpa [#allocation6], 0 }
   0x5   :  { %14 = vsyncpa [#allocation6 + $0x1], 0 }
   0x6   :  { %15 = vsyncpa [#allocation9], 0 }
   0x7   :  { %16 = vsyncpa [#allocation4], 0 }
   0x8   :  { %18 = vsyncpa [#allocation4 + $0x1], 0  ;;  %s1744_s15 = smov 0   ;;  %s1746_s16 = smov 0  }
   0x9   :  { %s1748_s17 = smov 0   ;;  %s1750_s18 = smov 0  }
   0xa LB: > { %s1765_s19 = sadd.s32 4294967295, %s1710_s18   ;;  %s1189_s20 = sadd.s32 4294967294, %s1710_s18   ;;  %s1710_s18 = sphi %s1750_s18, %s2342_s18   ;;  %s1706_s17 = sphi %s1748_s17, %s2341_s17   ;;  %s1702_s16 = sphi %s1746_s16, %s2340_s16   ;;  %s1698_s15 = sphi %s1744_s15, %s2339_s15  }
   0xb   : > { %p44_p0 = scmp.ne.s32.totalorder %s1702_s16, %s1698_s15  ;;  %p2313_p1 = scmp.eq.s32.totalorder %s1765_s19, 0 }
   0xc   : > { %p142_p3 = scmp.eq.s32.totalorder %s1189_s20, 1  ;;  %p1190_p5 = scmp.ge.s32.totalorder %s1710_s18, 1 }
   0xd   : > { %p1774_p4 = por %p2313_p1, %p44_p0  ;;  %p149_p7 = scmp.lt.s32.totalorder %s1710_s18, 3 }
   0xe   : > { %p1779_p6 = por %p142_p3, %p44_p0  ;;  %s1712_s24 = smov [#allocation7]  }
   0xf   : > { %s2321_s21 = scalar_select %p1774_p4, 1, 0 }
  0x10   : > { %s2322_s22 = scalar_select %p1779_p6, 1, 0 }
  0x11   : > { %p1784_p8 = pnand %p1190_p5, %p149_p7  ;;  %s161_s25 = sshll.u32 %s1712_s24, 4  ;;  %s1788_s25 = int_to_ptr.vmem [resolvable:$true] %s161_s25 }
  0x12   : > { %s1713_s27 = smov [#allocation8]   ;;  %s1516_s5 = scalar_lea.hbm %s2310_s2, 1024 }
  0x13   : > { %p1456_p9 = pneg %p1784_p8  ;;  %s174_s28 = sshll.u32 %s1713_s27, 4  ;;  %s1799_s28 = int_to_ptr.vmem [resolvable:$true] %s174_s28 }
  0x14   : > { %p1517_p12 = scmp.ne.s32.totalorder %s2310_s2, %s1516_s5  ;;  %p1523_p5 = scmp.lt.u32.totalorder %s1516_s5, %s2310_s2 }
  0x15   : > { %p1795_p11 = pnand %p1456_p9, %p2313_p1 }
  0x17   : > { %p1518_p13 = pneg %p1795_p11 }
  0x19   : > { %p1519_p0 = pnand %p1518_p13, %p1517_p12 }
  0x1b   : > { %p1520_p3 = pneg %p1519_p0 }
  0x1d   : > { %p1525_p7 = pnand %p1523_p5, %p1520_p3 }
  0x1f   : > { %1528 = shalt.err (!%p1525_p7)
}
  0x20   : > { %s1529_s10 = scalar_lea.vmem %s1788_s25, 1024  ;;  %p1537_p2 = scmp.lt.s32.totalorder %s1788_s25, %s1788_s25 }
  0x21   : > { %p1530_p9 = scmp.ne.s32.totalorder %s1788_s25, %s1529_s10  ;;  %p1538_p12 = scmp.lt.s32.totalorder %s1529_s10, %s1529_s10 }
  0x23   : > { %p1532_p10 = pnand %p1530_p9, %p1518_p13  ;;  %p1539_p0 = por %p1538_p12, %p1537_p2 }
  0x25   : > { %p1533_p1 = pneg %p1532_p10 }
  0x27   : > { %p1540_p6 = pnand %p1539_p0, %p1533_p1 }
  0x29   : > { %1543 = shalt.err (!%p1540_p6)
}
  0x2a   : > { %s2314_s11 = smov 128   ;;  %s2316_s12 = smov 8  }
  0x2b   : > { %1459 = dma.hbm_to_vmem [thread:$0]  (!%p1795_p11), %s2310_s2, 1024, %s1788_s25, [#allocation6], %s2314_s11, %s2314_s11, %s2316_s12  }
  0x2c   : > { %s1544_s27 = scalar_lea.hbm %s2311_s3, 256 }
  0x2d   : > { %p1545_p1 = scmp.ne.s32.totalorder %s2311_s3, %s1544_s27  ;;  %p1551_p10 = scmp.lt.u32.totalorder %s1544_s27, %s2311_s3 }
  0x2f   : > { %p1547_p2 = pnand %p1545_p1, %p1518_p13 }
  0x31   : > { %p1548_p6 = pneg %p1547_p2 }
  0x33   : > { %p1553_p3 = pnand %p1551_p10, %p1548_p6 }
  0x35   : > { %1556 = shalt.err (!%p1553_p3)
}
  0x36   : > { %s1557_s25 = scalar_lea.vmem %s1799_s28, 256  ;;  %p1565_p12 = scmp.lt.s32.totalorder %s1799_s28, %s1799_s28 }
  0x37   : > { %p1558_p5 = scmp.ne.s32.totalorder %s1799_s28, %s1557_s25  ;;  %p1566_p0 = scmp.lt.s32.totalorder %s1557_s25, %s1557_s25 }
  0x39   : > { %p1560_p7 = pnand %p1558_p5, %p1518_p13  ;;  %p1567_p1 = por %p1566_p0, %p1565_p12 }
  0x3b   : > { %p1561_p9 = pneg %p1560_p7 }
  0x3d   : > { %p1568_p2 = pnand %p1567_p1, %p1561_p9 }
  0x3f   : > { %1571 = shalt.err (!%p1568_p2)
}
  0x40   : > { %1462 = dma.hbm_to_vmem [thread:$0]  (!%p1795_p11), %s2311_s3, 256, %s1799_s28, [#allocation9], %s2314_s11, %s2314_s11, %s2316_s12  }
  0x41   : > { %s1860_s26 = sadd.s32 1, %s1710_s18   ;;  %s31_s9 = sadd.s32 1, %s1706_s17 }
  0x42   : > { %s28_s10 = ssub.s32 %s1710_s18, %s1860_s26  ;;  %p38_p13 = scmp.ne.s32.totalorder %s1706_s17, %s1702_s16 }
  0x43   : > { %p29_p6 = scmp.eq.s32.totalorder %s28_s10, 0  ;;  %p39_p10 = scmp.eq.s32.totalorder %s1710_s18, 0 }
  0x44   : > { %p2325_p3 = scmp.eq.s32.totalorder %s1765_s19, 1  ;;  %p1476_p7 = scmp.lt.s32.totalorder %s1710_s18, 2 }
  0x45   : > { %s1876_s14 = scalar_select %p29_p6, %s1706_s17, %s31_s9  }
  0x46   : > { %p1870_p5 = por %p2325_p3, %p38_p13  ;;  %p40_p9 = por %p39_p10, %p38_p13 }
  0x47   : > { %s188_s20 = sand.u32 1, %s1706_s17   ;;  %s1245_s28 = sshll.u32 %s1710_s18, 10 }
  0x48   : > { %s2326_s13 = scalar_select %p1870_p5, 1, 0 }
  0x49   : > { %s1194_s24 = sshll.u32 %s188_s20, 6  ;;  %s2327_s0 = sld [smem:[#allocation16_spill]] }
  0x4a   : > { %s192_s5 = scalar_lea.vmem [#allocation2], %s1194_s24  ;;  %p1887_p11 = pnand %p1476_p7, %p40_p9 }
  0x4b   : > { %s200_s6 = sshll.u32 %s192_s5, 4  ;;  %s1894_s9 = scalar_lea.hbm %s2309_s1, %s1245_s28  ;;  %s1885_s6 = int_to_ptr.vmem [resolvable:$true] %s200_s6 }
  0x4c   : > { %s214_s10 = scalar_lea.vmem [#allocation5], %s1194_s24  ;;  %s1898_s29 = scalar_lea.sflag [#allocation3], %s188_s20 }
  0x4d   : > { %s1896_s27 = sshll.u32 %s214_s10, 4  ;;  %p1574_p0 = pneg %p1887_p11  ;;  %s1930_s27 = int_to_ptr.vmem [resolvable:$true] %s1896_s27 }
  0x4f   : > { %s1883_s30 = scalar_lea.hbm %s2327_s0, %s1245_s28  ;;  %s1577_s7 = scalar_lea.hbm %s2327_s0, 2048 }
  0x50   : > { %s1572_s5 = scalar_lea.hbm %s1883_s30, 1024  ;;  %p1578_p13 = scmp.lt.u32.totalorder %s1883_s30, %s2327_s0 }
  0x51   : > { %p1573_p12 = scmp.ne.s32.totalorder %s1883_s30, %s1572_s5  ;;  %p1579_p6 = scmp.lt.u32.totalorder %s1577_s7, %s1572_s5 }
  0x52   : > { %p1581_p3 = scmp.lt.u32.totalorder %s1572_s5, %s1883_s30 }
  0x53   : > { %p1575_p1 = pnand %p1574_p0, %p1573_p12  ;;  %p1580_p10 = por %p1579_p6, %p1578_p13 }
  0x55   : > { %p1576_p2 = pneg %p1575_p1  ;;  %p1582_p7 = por %p1581_p3, %p1580_p10 }
  0x57   : > { %p1583_p9 = pnand %p1582_p7, %p1576_p2 }
  0x59   : > { %1586 = shalt.err (!%p1583_p9)
}
  0x5a   : > { %s1587_s20 = scalar_lea.vmem %s1885_s6, 1024  ;;  %s1716_s11 = smov [#allocation2]  }
  0x5b   : > { %p1588_p12 = scmp.ne.s32.totalorder %s1885_s6, %s1587_s20  ;;  %s1592_s12 = sshll.u32 %s1716_s11, 4  ;;  %s1593_s12 = int_to_ptr.vmem [resolvable:$false] %s1592_s12 }
  0x5c   : > { %s1594_s24 = scalar_lea.vmem %s1593_s12, 2048  ;;  %p1595_p4 = scmp.lt.s32.totalorder %s1885_s6, %s1593_s12 }
  0x5d   : > { %p1590_p1 = pnand %p1588_p12, %p1574_p0  ;;  %p1596_p13 = scmp.lt.s32.totalorder %s1594_s24, %s1587_s20 }
  0x5f   : > { %p1591_p5 = pneg %p1590_p1  ;;  %p1597_p6 = por %p1596_p13, %p1595_p4 }
  0x61   : > { %p1598_p10 = pnand %p1597_p6, %p1591_p5 }
  0x63   : > { %1601 = shalt.err (!%p1598_p10)
}
  0x64   : > { %s2329_s10 = smov 8   ;;  %s2330_s5 = smov 128  }
  0x65   : > { %1466 = dma.hbm_to_vmem [thread:$0]  (!%p1887_p11), %s1883_s30, 1024, %s1885_s6, %s1898_s29, %s2330_s5, %s2330_s5, %s2329_s10  }
  0x66   : > { %s210_s7 = sand.u32 1, %s1710_s18   ;;  %s1602_s28 = scalar_lea.hbm %s1894_s9, 1024 }
  0x67   : > { %s1933_s8 = scalar_lea.sflag [#allocation6], %s210_s7  ;;  %p1603_p4 = scmp.ne.s32.totalorder %s1894_s9, %s1602_s28 }
  0x68   : > { %s1607_s12 = scalar_lea.hbm %s2309_s1, 2048  ;;  %p1608_p3 = scmp.lt.u32.totalorder %s1894_s9, %s2309_s1 }
  0x69   : > { %p1605_p5 = pnand %p1603_p4, %p1574_p0  ;;  %p1609_p7 = scmp.lt.u32.totalorder %s1607_s12, %s1602_s28 }
  0x6a   : > { %p1611_p12 = scmp.lt.u32.totalorder %s1602_s28, %s1894_s9 }
  0x6b   : > { %p1606_p2 = pneg %p1605_p5  ;;  %p1610_p9 = por %p1609_p7, %p1608_p3 }
  0x6d   : > { %p1612_p1 = por %p1611_p12, %p1610_p9 }
  0x6f   : > { %p1613_p13 = pnand %p1612_p1, %p1606_p2 }
  0x71   : > { %1616 = shalt.err (!%p1613_p13)
}
  0x72   : > { %s1617_s30 = scalar_lea.vmem %s1930_s27, 1024  ;;  %s1717_s6 = smov [#allocation5]  }
  0x73   : > { %p1618_p6 = scmp.ne.s32.totalorder %s1930_s27, %s1617_s30  ;;  %s1622_s29 = sshll.u32 %s1717_s6, 4  ;;  %s1623_s29 = int_to_ptr.vmem [resolvable:$false] %s1622_s29 }
  0x74   : > { %s1624_s0 = scalar_lea.vmem %s1623_s29, 2048  ;;  %p1625_p5 = scmp.lt.s32.totalorder %s1930_s27, %s1623_s29 }
  0x75   : > { %p1620_p10 = pnand %p1618_p6, %p1574_p0  ;;  %p1626_p3 = scmp.lt.s32.totalorder %s1624_s0, %s1617_s30 }
  0x77   : > { %p1621_p4 = pneg %p1620_p10  ;;  %p1627_p7 = por %p1626_p3, %p1625_p5 }
  0x79   : > { %p1628_p9 = pnand %p1627_p7, %p1621_p4 }
  0x7b   : > { %1631 = shalt.err (!%p1628_p9)
}
  0x7c   : > { %1469 = dma.hbm_to_vmem [thread:$0]  (!%p1887_p11), %s1894_s9, 1024, %s1930_s27, %s1933_s8, %s2330_s5, %s2330_s5, %s2329_s10  }
  0x7d   : > { %234 = sbr.rel (%p1784_p8) target bundleno = 1069 (0x42d), region = 36  ;;  %s1965_s7 = sand.u32 (!%p1784_p8), 1, %s1702_s16  }
  0x7e   : > { %s1203_s28 = sshll.u32 (!%p1784_p8), %s1965_s7, 6  ;;  %s237_s20 = scalar_lea.sflag (!%p1784_p8), [#allocation3], %s1965_s7 }
  0x7f   : > { %s1969_s11 = scalar_lea.vmem (!%p1784_p8), [#allocation2], %s1203_s28  ;;  %p2331_p0 = scmp.ne.s32.totalorder (!%p1784_p8), %s2321_s21, 0 }
  0x84   : > { %1677 = dma.done.wait (%p2331_p0), %s237_s20, 1024  }
  0x85   : > { %1679 = vsyncadd (%p2331_p0), %s237_s20, 4294966272  ;;  %s245_s25 = sand.u32 1, %s1765_s19   ;;  %s1976_s9 = scalar_lea.vmem [#allocation5], %s1203_s28 }
  0x86   : > { %s246_s23 = scalar_lea.sflag [#allocation6], %s245_s25 }
  0x87   : > { %1681 = dma.done.wait (%p2331_p0), %s246_s23, 1024  }
  0x88   : > { %1683 = vsyncadd (%p2331_p0), %s246_s23, 4294966272  ;;  %p2332_p8 = scmp.eq.s32.totalorder %s1765_s19, 0 }
  0x8a   : > { %1685 = dma.done.wait (%p2332_p8), [#allocation6], 1024   ;;  %p2333_p11 = pmov %p2332_p8 }
  0x8b   : > { %p2334_p2 = pmov %p2332_p8 }
  0x8c   : > { %1687 = vsyncadd (%p2333_p11), [#allocation6], 4294966272 }
  0x8d   : > { %1689 = dma.done.wait (%p2334_p2), [#allocation9], 256   ;;  %p2335_p12 = pmov %p2334_p2 }
  0x8e   : > { %v305_v0 = vlaneseq  ;;  %v289_v9 = vld [vmem:[%s1969_s11] sm:$0xff]  ;;  %v290_v10 = vld [vmem:[%s1969_s11 + $0x8] sm:$0xff]  ;;  %v1998_v12 = vld [vmem:[%s1969_s11 + $0x10] sm:$0xff]  ;;  %vm458_vm3 = vcmask 523264   ;;  %vm351_vm5 = vcmask 130048   ;;  %s1207_s8 = sshll.u32 %s1965_s7, 3 }
  0x8f   : > { %1691 = vsyncadd (%p2335_p12), [#allocation9], 4294967040  ;;  %v1388_v15 = vpack.c.bf16 %v290_v10, %v289_v9  ;;  %v2001_v16 = vld [vmem:[%s1969_s11 + $0x18] sm:$0xff]  ;;  %v2006_v19 = vld [vmem:[%s1969_s11 + $0x20] sm:$0xff]  ;;  %s286_s25 = scalar_lea.vmem [#allocation10], %s1207_s8  ;;  %p2336_p13 = scmp.ne.s32.totalorder %s2326_s13, 0 }
  0x90   : > { %v306_v1 = vshrl.u32 %v305_v0, 7  ;;  %v1990_v2 = vand.u32 127, %v305_v0  ;;  %v1392_v18 = vpack.c.bf16 %v2001_v16, %v1998_v12  ;;  %v2009_v20 = vld [vmem:[%s1969_s11 + $0x28] sm:$0xff]  ;;  %v2011_v21 = vld [vmem:[#allocation7] sm:$0xff]  ;;  %v2018_v29 = vld [vmem:[%s1969_s11 + $0x30] sm:$0xff]  ;;  %s1077_s23 = sshll.u32 %s286_s25, 4  ;;  %s2266_s23 = int_to_ptr.vmem [resolvable:$true] %s1077_s23 }
  0x91   : > { %1389 = vmatprep.subr.bf16.mxu0 %v1388_v15  ;;  %1316 = vmatprep.mubr.msk.f32.mxu0 %vm458_vm3, %v2011_v21  ;;  %v1396_v26 = vpack.c.bf16 %v2009_v20, %v2006_v19  ;;  %v456_v27 = vld [vmem:[#allocation8] sm:$0xff]  ;;  %v457_v28 = vld [vmem:[#allocation8 + $0x8] sm:$0xff]  ;;  %v2021_v30 = vld [vmem:[%s1969_s11 + $0x38] sm:$0xff]  ;;  %s1241_s11 = sshll.u32 %s1765_s19, 7  ;;  %s1064_s19 = scalar_lea.sflag [#allocation4], %s1965_s7 }
  0x92   : > { %v307_v3 = vadd.s32 8, %v306_v1  ;;  %vm310_vm0 = vcmp.lt.s32.totalorder %v306_v1, 7  ;;  %vm324_vm1 = vcmp.lt.s32.totalorder %v1990_v2, 7  ;;  %v326_v4 = vsub.s32 15, %v1990_v2  ;;  %1391 = vmatpush3.bf16.msra.mxu0 %v1388_v15  ;;  %v2039_v43 = vld [vmem:[#allocation7 + $0x8] sm:$0xff]  ;;  %v2041_v44 = vld [vmem:[#allocation7 + $0x10] sm:$0xff] }
  0x93   : > { %v311_v5 = vsel %vm310_vm0, %v306_v1, 7  ;;  %v325_v6 = vsel %vm324_vm1, %v1990_v2, 7  ;;  %1393 = vmatprep.subr.bf16.mxu0 %v1392_v18  ;;  %v2023_v31 = vpack.c.bf16 %v457_v28, %v456_v27  ;;  %v1400_v36 = vpack.c.bf16 %v2021_v30, %v2018_v29  ;;  %v2048_v45 = vld [vmem:[#allocation7 + $0x18] sm:$0xff]  ;;  %v452_v46 = vld [vmem:[#allocation7 + $0x20] sm:$0xff]  ;;  %v453_v47 = vld [vmem:[#allocation7 + $0x28] sm:$0xff] }
  0x94   : > { %v315_v7 = vsub.s32 15, %v307_v3  ;;  %v320_v8 = vadd.s32 7, %v311_v5  ;;  %vm327_vm2 = vcmp.lt.s32.totalorder %v326_v4, 7  ;;  %v454_v48 = vld [vmem:[#allocation7 + $0x30] sm:$0xff]  ;;  %v455_v49 = vld [vmem:[#allocation7 + $0x38] sm:$0xff]  ;;  %v2058_v50 = vld [vmem:[%s1976_s9] sm:$0xff] }
  0x95   : > { %v328_v11 = vsel %vm327_vm2, %v326_v4, 7  ;;  %1405 = vmatprep.subr.bf16.mxu1 %v2023_v31  ;;  %v2061_v51 = vld [vmem:[%s1976_s9 + $0x8] sm:$0xff]  ;;  %v2074_v60 = vld [vmem:[%s1976_s9 + $0x10] sm:$0xff]  ;;  %v2077_v61 = vld [vmem:[%s1976_s9 + $0x18] sm:$0xff]  ;;  %vm1055_vm6 = vcmp.eq.s32.totalorder %v1990_v2, 2  ;;  %vm1054_vm7 = vcmp.eq.s32.totalorder %v1990_v2, 1 }
  0x96   : > { %vm318_vm4 = vcmp.lt.s32.totalorder %v315_v7, 7  ;;  %v322_v13 = vadd.s32 1, %v320_v8  ;;  %v329_v14 = vadd.s32 %v328_v11, %v325_v6  ;;  %1395 = vmatpush3.bf16.msra.mxu0 %v1392_v18  ;;  %1407 = vmatpush3.bf16.msra.mxu1 %v2023_v31  ;;  %v1408_v52 = vpack.c.bf16 %v2061_v51, %v2058_v50  ;;  %v2084_v1 = vld [vmem:[%s1976_s9 + $0x20] sm:$0xff]  ;;  %v2098_v11 = vld [vmem:[%s1976_s9 + $0x30] sm:$0xff] }
  0x97   : > { %v319_v17 = vsel %vm318_vm4, %v315_v7, 7  ;;  %1397 = vmatprep.subr.bf16.mxu0 %v1396_v26  ;;  %v1412_v6 = vpack.c.bf16 %v2077_v61, %v2074_v60  ;;  %v2091_v7 = vld [vmem:[%s1976_s9 + $0x28] sm:$0xff]  ;;  %vm1053_vm8 = vcmp.eq.s32.totalorder %v1990_v2, 0 }
  0x98   : > { %v321_v22 = vadd.s32 7, %v319_v17  ;;  %v330_v23 = vadd.s32 1, %v329_v14  ;;  %1409 = vmatprep.subr.bf16.mxu1 %v1408_v52 }
  0x9a   : > { %v323_v24 = vadd.s32 1, %v321_v22  ;;  %v331_v25 = vmul.u32 %v330_v23, %v322_v13  ;;  %1399 = vmatpush3.bf16.msra.mxu0 %v1396_v26  ;;  %v2101_v13 = vld [vmem:[%s1976_s9 + $0x38] sm:$0xff] }
  0x9b   : > { %1401 = vmatprep.subr.bf16.mxu0 %v1400_v36  ;;  %v1420_v17 = vpack.c.bf16 %v2101_v13, %v2098_v11 }
  0x9c   : > { %v332_v32 = vmul.u32 %v330_v23, %v323_v24  ;;  %v2025_v33 = vcvt.s32.f32 %v331_v25 }
  0x9e   : > { %v2028_v34 = vcvt.s32.f32 %v332_v32  ;;  %v335_v35 = vmul.f32 %v2025_v33, %v289_v9  ;;  %1403 = vmatpush3.bf16.msra.mxu0 %v1400_v36  ;;  %v337_v53 = vmul.f32 %v2025_v33, %v1998_v12  ;;  %v339_v62 = vmul.f32 %v2025_v33, %v2006_v19 }
  0x9f   : > { %1425 = vmatprep.subr.bf16.mxu0 %v2023_v31 }
  0xa0   : > { %v336_v37 = vmul.f32 %v2028_v34, %v290_v10  ;;  %v376_v38 = vmul.f32 %v335_v35, %v289_v9  ;;  %v338_v54 = vmul.f32 %v2028_v34, %v2001_v16  ;;  %v343_v55 = vmul.f32 %v335_v35, %v2058_v50 }
  0xa1   : > { %1317 = vmatmul.mubr.msk.f32.vlgmr.msra.gmra.mrb[0].mxu0 %vm458_vm3, %v2039_v43  ;;  %v345_v63 = vmul.f32 %v337_v53, %v2074_v60  ;;  %v347_v3 = vmul.f32 %v339_v62, %v2084_v1  ;;  %v340_v24 = vmul.f32 %v2028_v34, %v2009_v20  ;;  %v380_v32 = vmul.f32 %v339_v62, %v2006_v19 }
  0xa2   : > { %v377_v39 = vmul.f32 %v336_v37, %v290_v10  ;;  %v384_v40 = vsel %vm351_vm5, %v376_v38, 0.0  ;;  %1319 = vmatprep.mubr.msk.f32.mxu0 %vm458_vm3, %v2041_v44  ;;  %1427 = vmatpush3.bf16.msra.mxu0 %v2023_v31  ;;  %v344_v56 = vmul.f32 %v336_v37, %v2061_v51  ;;  %v352_v57 = vsel %vm351_vm5, %v343_v55, 0.0 }
  0xa3   : > { %v346_v0 = vmul.f32 %v338_v54, %v2077_v61  ;;  %v1416_v10 = vpack.c.bf16 %v2091_v7, %v2084_v1  ;;  %v355_v23 = vsel %vm351_vm5, %v345_v63, 0.0  ;;  %v379_v26 = vmul.f32 %v338_v54, %v2001_v16 }
  0xa4   : > { %v385_v41 = vsel %vm351_vm5, %v377_v39, 0.0  ;;  %v353_v58 = vsel %vm351_vm5, %v344_v56, 0.0  ;;  %v341_v35 = vmul.f32 %v2025_v33, %v2018_v29  ;;  %v359_v36 = vsel %vm351_vm5, %v347_v3, 0.0 }
  0xa5   : > { %v2037_v42 = vadd.f32 %v385_v41, %v384_v40  ;;  %1320 = vmatmul.mubr.msk.f32.gmra.mrb[2].mxu0 %vm458_vm3, %v2048_v45  ;;  %v354_v59 = vadd.f32 %v353_v58, %v352_v57  ;;  %v357_v28 = vsel %vm351_vm5, %v346_v0, 0.0  ;;  %v342_v16 = vmul.f32 %v2028_v34, %v2021_v30 }
  0xa6   : > { %1322 = vmatprep.mubr.msk.f32.mxu0 %vm458_vm3, %v452_v46  ;;  %v349_v39 = vmul.f32 %v341_v35, %v2098_v11  ;;  %v389_v41 = vsel %vm351_vm5, %v379_v26, 0.0 }
  0xa7   : > { %v356_v25 = vadd.f32 %v355_v23, %v354_v59  ;;  %v383_v56 = vmul.f32 %v342_v16, %v2021_v30 }
  0xa9   : > { %1323 = vmatmul.mubr.msk.f32.gmra.mrb[4].mxu0 %vm458_vm3, %v453_v47 }
  0xaa   : > { %1325 = vmatprep.mubr.msk.f32.mxu0 %vm458_vm3, %v454_v48 }
  0xad   : > { %1326 = vmatmul.mubr.msk.f32.gmra.mrb[6].mxu0 %vm458_vm3, %v455_v49 }
 0x174   : > { %v1318_v4 = vpop.f32.mrb[0].mxu0 }
 0x175   : > { %v549_v5 = vpop.f32.mrb[1].mxu0 }
 0x176   : > { %1332 = vmatprep.mubr.msk.f32.mxu1 %vm351_vm5, %v549_v5 }
 0x177   : > { %1333 = vmatmul.mubr.msk.f32.vlgmr.msra.gmra.mrb[0].mxu1 %vm351_vm5, %v1318_v4 }
 0x178   : > { %1411 = vmatpush3.bf16.msra.mxu1 %v1408_v52  ;;  %v1321_v8 = vpop.f32.mrb[2].mxu0  ;;  %v382_v52 = vmul.f32 %v341_v35, %v2018_v29 }
 0x179   : > { %v559_v9 = vpop.f32.mrb[3].mxu0  ;;  %1413 = vmatprep.subr.bf16.mxu1 %v1412_v6 }
 0x17a   : > { %1335 = vmatprep.mubr.msk.f32.mxu1 %vm351_vm5, %v559_v9  ;;  %v395_v57 = vsel %vm351_vm5, %v382_v52, 0.0  ;;  %v411_v52 = vmul.f32 %v2077_v61, %v2077_v61 }
 0x17b   : > { %1336 = vmatmul.mubr.msk.f32.gmra.mrb[2].mxu1 %vm351_vm5, %v1321_v8 }
 0x17c   : > { %1415 = vmatpush3.bf16.msra.mxu1 %v1412_v6  ;;  %v1324_v14 = vpop.f32.mrb[4].mxu0 }
 0x17d   : > { %v569_v15 = vpop.f32.mrb[5].mxu0  ;;  %1417 = vmatprep.subr.bf16.mxu1 %v1416_v10 }
 0x17e   : > { %1338 = vmatprep.mubr.msk.f32.mxu1 %vm351_vm5, %v569_v15 }
 0x17f   : > { %1339 = vmatmul.mubr.msk.f32.gmra.mrb[4].mxu1 %vm351_vm5, %v1324_v14 }
 0x180   : > { %1419 = vmatpush3.bf16.msra.mxu1 %v1416_v10  ;;  %v1327_v18 = vpop.f32.mrb[6].mxu0 }
 0x181   : > { %v579_v22 = vpop.f32.mrb[7].mxu0  ;;  %1421 = vmatprep.subr.bf16.mxu1 %v1420_v17 }
 0x182   : > { %1341 = vmatprep.mubr.msk.f32.mxu1 %vm351_vm5, %v579_v22 }
 0x183   : > { %1342 = vmatmul.mubr.msk.f32.gmra.mrb[6].mxu1 %vm351_vm5, %v1327_v18 }
 0x184   : > { %1423 = vmatpush3.bf16.msra.mxu1 %v1420_v17  ;;  %1360 = vmatprep.mubr.msk.f32.mxu1 %vm458_vm3, %v2011_v21  ;;  %v378_v21 = vmul.f32 %v337_v53, %v1998_v12  ;;  %v348_v12 = vmul.f32 %v340_v24, %v2091_v7 }
 0x185   : > { %1428 = vmatprep.subr.bf16.mxu1 %v2023_v31 }
 0x186   : > { %v387_v27 = vsel %vm351_vm5, %v378_v21, 0.0  ;;  %v361_v40 = vsel %vm351_vm5, %v348_v12, 0.0 }
 0x187   : > { %1361 = vmatmul.mubr.msk.f32.vlgmr.msra.gmra.mrb[8].mxu1 %vm458_vm3, %v2039_v43  ;;  %v388_v38 = vadd.f32 %v387_v27, %v2037_v42 }
 0x188   : > { %1363 = vmatprep.mubr.msk.f32.mxu1 %vm458_vm3, %v2041_v44  ;;  %1429 = vmatpush3.bf16.msra.mxu1 %v2023_v31  ;;  %v358_v31 = vadd.f32 %v357_v28, %v356_v25  ;;  %v350_v44 = vmul.f32 %v342_v16, %v2101_v13 }
 0x189   : > { %v390_v43 = vadd.f32 %v389_v41, %v388_v38 }
 0x18a   : > { %v360_v37 = vadd.f32 %v359_v36, %v358_v31 }
 0x18b   : > { %1364 = vmatmul.mubr.msk.f32.gmra.mrb[10].mxu1 %vm458_vm3, %v2048_v45  ;;  %v363_v45 = vsel %vm351_vm5, %v349_v39, 0.0 }
 0x18c   : > { %1366 = vmatprep.mubr.msk.f32.mxu1 %vm458_vm3, %v452_v46  ;;  %v362_v19 = vadd.f32 %v361_v40, %v360_v37  ;;  %v381_v46 = vmul.f32 %v340_v24, %v2009_v20  ;;  %v397_v20 = vsel %vm351_vm5, %v383_v56, 0.0 }
 0x18e   : > { %v364_v42 = vadd.f32 %v363_v45, %v362_v19  ;;  %v393_v53 = vsel %vm351_vm5, %v381_v46, 0.0  ;;  %v408_v46 = vmul.f32 %v2058_v50, %v2058_v50  ;;  %v419_v50 = vmul.f32 %v411_v52, %v2028_v34 }
 0x18f   : > { %1367 = vmatmul.mubr.msk.f32.gmra.mrb[12].mxu1 %vm458_vm3, %v453_v47  ;;  %v391_v47 = vsel %vm351_vm5, %v380_v32, 0.0 }
 0x190   : > { %1369 = vmatprep.mubr.msk.f32.mxu1 %vm458_vm3, %v454_v48  ;;  %v392_v48 = vadd.f32 %v391_v47, %v390_v43  ;;  %v409_v47 = vmul.f32 %v2061_v51, %v2061_v51  ;;  %v412_v51 = vmul.f32 %v2084_v1, %v2084_v1 }
 0x192   : > { %v394_v55 = vadd.f32 %v393_v53, %v392_v48  ;;  %v417_v48 = vmul.f32 %v409_v47, %v2028_v34  ;;  %v420_v61 = vmul.f32 %v412_v51, %v2025_v33 }
 0x193   : > { %1370 = vmatmul.mubr.msk.f32.gmra.mrb[14].mxu1 %vm458_vm3, %v455_v49  ;;  %v365_v49 = vsel %vm351_vm5, %v350_v44, 0.0 }
 0x194   : > { %v366_v54 = vadd.f32 %v365_v49, %v364_v42  ;;  %v396_v58 = vadd.f32 %v395_v57, %v394_v55  ;;  %v416_v42 = vmul.f32 %v408_v46, %v2025_v33  ;;  %v410_v49 = vmul.f32 %v2074_v60, %v2074_v60 }
 0x195   : > { %v413_v57 = vmul.f32 %v2091_v7, %v2091_v7 }
 0x196   : > { %367 = vadd.xlane.f32.xlu0 %v366_v54  ;;  %v398_v59 = vadd.f32 %v397_v20, %v396_v58  ;;  %v424_v53 = vsel %vm351_vm5, %v416_v42, 0.0  ;;  %v425_v54 = vsel %vm351_vm5, %v417_v48, 0.0  ;;  %v418_v55 = vmul.f32 %v410_v49, %v2025_v33 }
 0x197   : > { %v426_v56 = vadd.f32 %v425_v54, %v424_v53  ;;  %v429_v20 = vsel %vm351_vm5, %v419_v50, 0.0 }
 0x198   : > { %v427_v60 = vsel %vm351_vm5, %v418_v55, 0.0 }
 0x199   : > { %v428_v58 = vadd.f32 %v427_v60, %v426_v56 }
 0x19a   : > { %399 = vadd.xlane.f32.xlu0 %v398_v59 }
 0x19b   : > { %v430_v59 = vadd.f32 %v429_v20, %v428_v58 }
 0x223   : > { %v368_v49 = vpop.xlane.xlu0 %367 }
 0x24a   : > { %v2152_v62 = vpop.f32.mrb[0].mxu1 }
 0x24b   : > { %v984_v63 = vmul.f32 %v2152_v62, %v2152_v62  ;;  %v2156_v29 = vpop.f32.mrb[1].mxu1 }
 0x24c   : > { %v983_v0 = vmul.f32 %v2156_v29, %v2156_v29 }
 0x24d   : > { %v992_v30 = vsel %vm351_vm5, %v984_v63, 0.0  ;;  %v414_v63 = vmul.f32 %v2098_v11, %v2098_v11 }
 0x24e   : > { %v991_v3 = vsel %vm351_vm5, %v983_v0, 0.0  ;;  %v2162_v4 = vpop.f32.mrb[2].mxu1  ;;  %v421_v0 = vmul.f32 %v413_v57, %v2028_v34 }
 0x24f   : > { %v993_v5 = vadd.f32 %v992_v30, %v991_v3  ;;  %v2164_v6 = vpop.f32.mrb[3].mxu1  ;;  %v986_v8 = vmul.f32 %v2162_v4, %v2162_v4  ;;  %v431_v30 = vsel %vm351_vm5, %v420_v61, 0.0  ;;  %v415_v3 = vmul.f32 %v2101_v13, %v2101_v13 }
 0x250   : > { %v985_v9 = vmul.f32 %v2164_v6, %v2164_v6  ;;  %v432_v1 = vadd.f32 %v431_v30, %v430_v59  ;;  %v422_v7 = vmul.f32 %v414_v63, %v2025_v33 }
 0x251   : > { %v996_v18 = vsel %vm351_vm5, %v986_v8, 0.0 }
 0x252   : > { %v994_v10 = vsel %vm351_vm5, %v985_v9, 0.0  ;;  %v2171_v14 = vpop.f32.mrb[4].mxu1  ;;  %v423_v9 = vmul.f32 %v415_v3, %v2028_v34 }
 0x253   : > { %v995_v15 = vadd.f32 %v994_v10, %v993_v5  ;;  %v2173_v17 = vpop.f32.mrb[5].mxu1  ;;  %v988_v22 = vmul.f32 %v2171_v14, %v2171_v14  ;;  %v433_v5 = vsel %vm351_vm5, %v421_v0, 0.0  ;;  %v435_v10 = vsel %vm351_vm5, %v422_v7, 0.0 }
 0x254   : > { %v987_v21 = vmul.f32 %v2173_v17, %v2173_v17  ;;  %v434_v8 = vadd.f32 %v433_v5, %v432_v1  ;;  %v437_v11 = vsel %vm351_vm5, %v423_v9, 0.0  ;;  %v400_v1 = vpop.xlane.xlu0 %399  ;;  %v369_v7 = vrot.slane %v368_v49, 4 }
 0x255   : > { %v997_v23 = vadd.f32 %v996_v18, %v995_v15  ;;  %v1000_v28 = vsel %vm351_vm5, %v988_v22, 0.0  ;;  %v401_v5 = vrot.slane %v400_v1, 4 }
 0x256   : > { %v998_v24 = vsel %vm351_vm5, %v987_v21, 0.0  ;;  %v2181_v25 = vpop.f32.mrb[6].mxu1  ;;  %v436_v15 = vadd.f32 %v435_v10, %v434_v8 }
 0x257   : > { %v999_v26 = vadd.f32 %v998_v24, %v997_v23  ;;  %v2183_v27 = vpop.f32.mrb[7].mxu1  ;;  %v990_v31 = vmul.f32 %v2181_v25, %v2181_v25  ;;  %v402_v10 = vadd.f32 %v401_v5, %v400_v1 }
 0x258   : > { %v989_v32 = vmul.f32 %v2183_v27, %v2183_v27  ;;  %v438_v18 = vadd.f32 %v437_v11, %v436_v15 }
 0x259   : > { %v1001_v35 = vadd.f32 %v1000_v28, %v999_v26  ;;  %v1004_v16 = vsel %vm351_vm5, %v990_v31, 0.0 }
 0x25a   : > { %v1002_v12 = vsel %vm351_vm5, %v989_v32, 0.0  ;;  %v1362_v36 = vpop.f32.mrb[8].mxu1  ;;  %439 = vadd.xlane.f32.xlu1 %v438_v18 }
 0x25b   : > { %v783_v37 = vpop.f32.mrb[9].mxu1  ;;  %v1003_v38 = vadd.f32 %v1002_v12, %v1001_v35 }
 0x25c   : > { %1376 = vmatprep.mubr.msk.f32.mxu0 %vm351_vm5, %v783_v37 }
 0x25d   : > { %1377 = vmatmul.mubr.msk.f32.vlgmr.msra.gmra.mrb[8].mxu0 %vm351_vm5, %v1362_v36  ;;  %v1005_v39 = vadd.f32 %v1004_v16, %v1003_v38 }
 0x25e   : > { %v1365_v40 = vpop.f32.mrb[10].mxu1 }
 0x25f   : > { %v793_v41 = vpop.f32.mrb[11].mxu1  ;;  %1006 = vadd.xlane.f32.xlu0 %v1005_v39 }
 0x260   : > { %1379 = vmatprep.mubr.msk.f32.mxu0 %vm351_vm5, %v793_v41 }
 0x261   : > { %1380 = vmatmul.mubr.msk.f32.gmra.mrb[10].mxu0 %vm351_vm5, %v1365_v40 }
 0x262   : > { %v1368_v19 = vpop.f32.mrb[12].mxu1 }
 0x263   : > { %v803_v43 = vpop.f32.mrb[13].mxu1 }
 0x264   : > { %1382 = vmatprep.mubr.msk.f32.mxu0 %vm351_vm5, %v803_v43 }
 0x265   : > { %1383 = vmatmul.mubr.msk.f32.gmra.mrb[12].mxu0 %vm351_vm5, %v1368_v19 }
 0x266   : > { %v1371_v44 = vpop.f32.mrb[14].mxu1 }
 0x267   : > { %v813_v45 = vpop.f32.mrb[15].mxu1 }
 0x268   : > { %1385 = vmatprep.mubr.msk.f32.mxu1 %vm351_vm5, %v813_v45 }
 0x269   : > { %1386 = vmatmul.mubr.msk.f32.vlgmr.msra.gmra.mrb[16].mxu1 %vm351_vm5, %v1371_v44 }
 0x2e7   : > { %v440_v15 = vpop.xlane.xlu1 %439 }
 0x2e8   : > { %v441_v11 = vrot.slane %v440_v15, 4 }
 0x330   : > { %v1378_v22 = vpop.f32.mrb[8].mxu0 }
 0x331   : > { %v952_v21 = vmul.f32 %v1378_v22, %v2152_v62  ;;  %v1016_v23 = vmul.f32 %v1378_v22, %v1378_v22  ;;  %v912_v24 = vpop.f32.mrb[9].mxu0  ;;  %v403_v22 = vrot.slane %v402_v10, 2 }
 0x332   : > { %v951_v13 = vmul.f32 %v912_v24, %v2156_v29  ;;  %v1015_v33 = vmul.f32 %v912_v24, %v912_v24 }
 0x333   : > { %v960_v26 = vsel %vm351_vm5, %v952_v21, 0.0  ;;  %v1024_v28 = vsel %vm351_vm5, %v1016_v23, 0.0  ;;  %v442_v21 = vadd.f32 %v441_v11, %v440_v15 }
 0x334   : > { %v959_v34 = vsel %vm351_vm5, %v951_v13, 0.0  ;;  %v1023_v31 = vsel %vm351_vm5, %v1015_v33, 0.0  ;;  %v1381_v32 = vpop.f32.mrb[10].mxu0  ;;  %v404_v13 = vadd.f32 %v403_v22, %v402_v10 }
 0x335   : > { %v961_v35 = vadd.f32 %v960_v26, %v959_v34  ;;  %v1025_v12 = vadd.f32 %v1024_v28, %v1023_v31  ;;  %v954_v36 = vmul.f32 %v1381_v32, %v2162_v4  ;;  %v922_v37 = vpop.f32.mrb[11].mxu0  ;;  %v1018_v62 = vmul.f32 %v1381_v32, %v1381_v32 }
 0x336   : > { %v953_v38 = vmul.f32 %v922_v37, %v2164_v6  ;;  %v1017_v16 = vmul.f32 %v922_v37, %v922_v37  ;;  %v443_v23 = vrot.slane %v442_v21, 2  ;;  %v405_v28 = vrot.slane %v404_v13, 1 }
 0x337   : > { %v964_v41 = vsel %vm351_vm5, %v954_v36, 0.0  ;;  %v1028_v46 = vsel %vm351_vm5, %v1018_v62, 0.0 }
 0x338   : > { %v962_v29 = vsel %vm351_vm5, %v953_v38, 0.0  ;;  %v1026_v39 = vsel %vm351_vm5, %v1017_v16, 0.0  ;;  %v1384_v40 = vpop.f32.mrb[12].mxu0  ;;  %v444_v33 = vadd.f32 %v443_v23, %v442_v21  ;;  %v406_v32 = vadd.f32 %v405_v28, %v404_v13 }
 0x339   : > { %v963_v19 = vadd.f32 %v962_v29, %v961_v35  ;;  %v1027_v43 = vadd.f32 %v1026_v39, %v1025_v12  ;;  %v956_v44 = vmul.f32 %v1384_v40, %v2171_v14  ;;  %v932_v45 = vpop.f32.mrb[13].mxu0  ;;  %v1020_v4 = vmul.f32 %v1384_v40, %v1384_v40  ;;  %v1007_v12 = vpop.xlane.xlu0 %1006 }
 0x33a   : > { %v955_v47 = vmul.f32 %v932_v45, %v2173_v17  ;;  %v1019_v42 = vmul.f32 %v932_v45, %v932_v45  ;;  %v445_v34 = vrot.slane %v444_v33, 1  ;;  %v1008_v36 = vrot.slane %v1007_v12, 4 }
 0x33b   : > { %v965_v6 = vadd.f32 %v964_v41, %v963_v19  ;;  %v1029_v48 = vadd.f32 %v1028_v46, %v1027_v43  ;;  %v968_v55 = vsel %vm351_vm5, %v956_v44, 0.0  ;;  %v1032_v57 = vsel %vm351_vm5, %v1020_v4, 0.0 }
 0x33c   : > { %v966_v52 = vsel %vm351_vm5, %v955_v47, 0.0  ;;  %v1030_v53 = vsel %vm351_vm5, %v1019_v42, 0.0  ;;  %v1387_v54 = vpop.f32.mrb[16].mxu1  ;;  %v446_v35 = vadd.f32 %v445_v34, %v444_v33  ;;  %v1009_v37 = vadd.f32 %v1008_v36, %v1007_v12 }
 0x33d   : > { %v967_v50 = vadd.f32 %v966_v52, %v965_v6  ;;  %v1031_v51 = vadd.f32 %v1030_v53, %v1029_v48  ;;  %v958_v14 = vmul.f32 %v1387_v54, %v2181_v25  ;;  %v942_v56 = vpop.f32.mrb[17].mxu1  ;;  %v1022_v60 = vmul.f32 %v1387_v54, %v1387_v54 }
 0x33e   : > { %v957_v17 = vmul.f32 %v942_v56, %v2183_v27  ;;  %v1021_v58 = vmul.f32 %v942_v56, %v942_v56  ;;  %v370_v27 = vadd.f32 %v369_v7, %v368_v49  ;;  %v1010_v62 = vrot.slane %v1009_v37, 2 }
 0x33f   : > { %v969_v61 = vadd.f32 %v968_v55, %v967_v50  ;;  %v1033_v20 = vadd.f32 %v1032_v57, %v1031_v51  ;;  %v972_v3 = vsel %vm351_vm5, %v958_v14, 0.0  ;;  %v1036_v25 = vsel %vm351_vm5, %v1022_v60, 0.0 }
 0x340   : > { %v970_v59 = vsel %vm351_vm5, %v957_v17, 0.0  ;;  %v1034_v63 = vsel %vm351_vm5, %v1021_v58, 0.0  ;;  %v371_v18 = vrot.slane %v370_v27, 2  ;;  %v1011_v39 = vadd.f32 %v1010_v62, %v1009_v37 }
 0x341   : > { %v971_v0 = vadd.f32 %v970_v59, %v969_v61  ;;  %v1035_v30 = vadd.f32 %v1034_v63, %v1033_v20 }
 0x342   : > { %v372_v24 = vadd.f32 %v371_v18, %v370_v27  ;;  %v1012_v45 = vrot.slane %v1011_v39, 1 }
 0x343   : > { %v973_v8 = vadd.f32 %v972_v3, %v971_v0  ;;  %v1037_v9 = vadd.f32 %v1036_v25, %v1035_v30 }
 0x344   : > { %v373_v26 = vrot.slane %v372_v24, 1  ;;  %v1013_v6 = vadd.f32 %v1012_v45, %v1011_v39 }
 0x345   : > { %974 = vadd.xlane.f32.xlu1 %v973_v8 }
 0x346   : > { %v374_v31 = vadd.f32 %v373_v26, %v372_v24 }
 0x348   : > { %1430 = vpush %v374_v31 }
 0x349   : > { %1038 = vadd.xlane.f32.xlu1 %v1037_v9  ;;  %1432 = vpush %v406_v32 }
 0x34a   : > { %1434 = vpush %v446_v35 }
 0x379   : > { %s1431_s21 = spop %1430 }
 0x37a   : > { %s1433_s27 = spop %1432 }
 0x37b   : > { %s1435_s10 = spop %1434 }
 0x3d2   : > { %v975_v38 = vpop.xlane.xlu1 %974 }
 0x3d3   : > { %v976_v16 = vrot.slane %v975_v38, 4 }
 0x3d5   : > { %v977_v29 = vadd.f32 %v976_v16, %v975_v38 }
 0x3d6   : > { %v1039_v40 = vpop.xlane.xlu1 %1038 }
 0x3d7   : > { %v978_v41 = vrot.slane %v977_v29, 2  ;;  %v1040_v19 = vrot.slane %v1039_v40, 4 }
 0x3d9   : > { %v1041_v43 = vadd.f32 %v1040_v19, %v1039_v40  ;;  %v979_v44 = vadd.f32 %v978_v41, %v977_v29 }
 0x3db   : > { %v1042_v46 = vrot.slane %v1041_v43, 2  ;;  %v980_v4 = vrot.slane %v979_v44, 1 }
 0x3dd   : > { %v1043_v47 = vadd.f32 %v1042_v46, %v1041_v43  ;;  %v981_v42 = vadd.f32 %v980_v4, %v979_v44 }
 0x3df   : > { %1436 = vpush %v981_v42  ;;  %v1044_v48 = vrot.slane %v1043_v47, 1 }
 0x3e0   : > { %1438 = vpush %v1013_v6 }
 0x3e1   : > { %v1045_v49 = vadd.f32 %v1044_v48, %v1043_v47 }
 0x3e3   : > { %1440 = vpush %v1045_v49 }
 0x410   : > { %s1437_s5 = spop %1436 }
 0x411   : > { %s1047_s12 = smul.f32 0.0044444446, %s1437_s5  ;;  %s1439_s24 = spop %1438 }
 0x412   : > { %s1049_s30 = smul.f32 0.0044444446, %s1439_s24  ;;  %s1718_s5 = smov [#allocation10]  }
 0x413   : > { %s1048_s29 = ssub.f32 %s1431_s21, %s1047_s12  ;;  %s1636_s8 = sshll.u32 %s1718_s5, 4  ;;  %s1637_s8 = int_to_ptr.vmem [resolvable:$false] %s1636_s8 }
 0x414   : > { %s1441_s6 = spop %1440  ;;  %s1050_s28 = ssub.f32 %s1433_s27, %s1049_s30 }
 0x415   : > { %s1051_s0 = smul.f32 0.0044444446, %s1441_s6  ;;  %v1060_v55 = vstv %s1048_s29  ;;  %s2264_s27 = scalar_lea.hbm %s2312_s4, %s1241_s11 }
 0x416   : > { %v1058_v53 = vstv %s1050_s28  ;;  %s1638_s12 = scalar_lea.vmem %s1637_s8, 256  ;;  %p1639_p4 = scmp.lt.s32.totalorder %s2266_s23, %s1637_s8 }
 0x417   : > { %s1052_s20 = ssub.f32 %s1435_s10, %s1051_s0  ;;  %s1632_s10 = scalar_lea.vmem %s2266_s23, 128 }
 0x418   : > { %p1633_p1 = scmp.ne.s32.totalorder %s2266_s23, %s1632_s10  ;;  %p1640_p5 = scmp.lt.s32.totalorder %s1638_s12, %s1632_s10 }
 0x419   : > { %v1056_v52 = vstv %s1052_s20 }
 0x41a   : > { %v1057_v54 = vsel %vm1055_vm6, %v1056_v52, 0.0  ;;  %p1634_p6 = pnand %p1633_p1, %p2336_p13  ;;  %p1641_p3 = por %p1640_p5, %p1639_p4 }
 0x41b   : > { %v1059_v50 = vsel %vm1054_vm7, %v1058_v53, %v1057_v54 }
 0x41c   : > { %v1061_v51 = vsel %vm1053_vm8, %v1060_v55, %v1059_v50  ;;  %p1635_p10 = pneg %p1634_p6 }
 0x41d   : > { %1062 = vst [vmem:[%s286_s25] sm:$0xff] %v1061_v51 }
 0x41e   : > { %p1642_p7 = pnand %p1641_p3, %p1635_p10 }
 0x420   : > { %1645 = shalt.err (!%p1642_p7)
}
 0x421   : > { %s1646_s7 = scalar_lea.hbm %s2264_s27, 128  ;;  %s1650_s6 = scalar_lea.hbm %s2312_s4, 256 }
 0x422   : > { %p1647_p9 = scmp.ne.s32.totalorder %s2264_s27, %s1646_s7  ;;  %p1651_p11 = scmp.lt.u32.totalorder %s2264_s27, %s2312_s4 }
 0x423   : > { %p1652_p2 = scmp.lt.u32.totalorder %s1650_s6, %s1646_s7  ;;  %p1654_p1 = scmp.lt.u32.totalorder %s1646_s7, %s2264_s27 }
 0x424   : > { %p1648_p0 = pnand %p1647_p9, %p2336_p13 }
 0x425   : > { %p1653_p12 = por %p1652_p2, %p1651_p11 }
 0x426   : > { %p1649_p8 = pneg %p1648_p0 }
 0x427   : > { %p1655_p6 = por %p1654_p1, %p1653_p12 }
 0x429   : > { %p1656_p10 = pnand %p1655_p6, %p1649_p8 }
 0x42b   : > { %1659 = shalt.err (!%p1656_p10)
}
 0x42c   : > { %1454 = dma.vmem_to_hbm [thread:$0]  (%p2336_p13), %s2266_s23, 128, %s2264_s27, %s1064_s19  }
 0x42d PF: > { %s1089_s28 = sand.u32 1, %s1698_s15   ;;  %p2337_p4 = scmp.ne.s32.totalorder %s2322_s22, 0 }
 0x42e   : > { %p2338_p5 = scmp.ge.s32.totalorder %s1710_s18, 2  ;;  %s1090_s20 = scalar_lea.sflag [#allocation4], %s1089_s28 }
 0x430   : > { %p1471_p3 = pnand %p2338_p5, %p2337_p4 }
 0x432   : > { %1693 = dma.done.wait (!%p1471_p3), %s1090_s20, 128  }
 0x433   : > { %1695 = vsyncadd (!%p1471_p3), %s1090_s20, 4294967168  ;;  %p21_p7 = scmp.ge.s32.totalorder %s1860_s26, 4   ;;  %s2339_s15 = smov %s1702_s16 }
 0x434   : > { %s2340_s16 = smov %s1706_s17  ;;  %s2341_s17 = smov %s1876_s14 }
 0x435   : > { %s2342_s18 = smov %s1860_s26  ;;  %23 = sbr.rel (!%p21_p7) target bundleno = 10 (0xa), region = 102 }
 0x43c   :  { %1095 = vsyncpa [#allocation3], 1 }
 0x43d   :  { %1097 = vsyncpa [#allocation3 + $0x1], 1 }
 0x43e   :  { %1098 = vsyncpa [#allocation6], 1 }
 0x43f   :  { %1100 = vsyncpa [#allocation6 + $0x1], 1 }
 0x440   :  { %1101 = vsyncpa [#allocation9], 1 }
 0x441   :  { %1102 = vsyncpa [#allocation4], 1 }
 0x442   :  { %1104 = vsyncpa [#allocation4 + $0x1], 1 }

</bundles_post_ra>
